<compile_context>
chip_gen: v6e
topology: v6e:2x2x1
jax: 0.10.0
libtpu: 0.0.40
codegen_flags: <defaults>
</compile_context>

<pallas_src>
import math

import jax
import jax.numpy as jnp
from jax.experimental import pallas as pl
from jax.experimental.pallas import tpu as pltpu

LANE = 128
_VMEM_WORKING_SET_BUDGET = 40 * 1024 * 1024   # DB'd inputs + in-kernel temporaries
_VMEM_LIMIT_BYTES = 48 * 1024 * 1024          # requested scoped VMEM (<= v7x 64 MiB/TC)
_MAX_TILE_ROWS = 8192


def _cdiv(a, b):
    return -(-a // b)


def pixel_unshuffle(fm, r):
    """[B, c, r*h, r*w] -> [B, c*r*r, h, w] (same semantics as the torch helper)."""
    b, c, h, w = fm.shape
    fm = fm.reshape(b, c, h // r, r, w // r, r)
    fm = jnp.transpose(fm, (0, 1, 3, 5, 2, 4))
    return fm.reshape(b, c * r * r, h // r, w // r)


def pixel_shuffle(fm, r):
    """Exact inverse of pixel_unshuffle: [B, c*r*r, h, w] -> [B, c, h*r, w*r]."""
    b, crr, h, w = fm.shape
    c = crr // (r * r)
    fm = fm.reshape(b, c, r, r, h, w)
    fm = jnp.transpose(fm, (0, 1, 4, 2, 5, 3))
    return fm.reshape(b, c, h * r, w * r)


def _num_tensorcores():
    """Best-effort TensorCore count per chip (1 on v5e/v6e, 2 on v7x)."""
    try:
        info = pltpu.get_tpu_info()
        for name in ("num_cores", "num_tensorcores", "core_count",
                     "tensorcores_per_chip", "num_cores_per_chip"):
            n = getattr(info, name, None)
            if isinstance(n, int) and n >= 1:
                return n
    except Exception:
        pass
    return 1


def _sublane_multiple(dtypes):
    """Second-minor tile multiple for the mix of input dtypes (8/16/32)."""
    sub = 8
    for dt in dtypes:
        sub = max(sub, 8 * max(1, 4 // jnp.dtype(dt).itemsize))
    return sub


def _choose_tile_rows(n_rows, in_itemsizes, sub):
    # Per-row VMEM bytes: double-buffered pipeline copies of every input block
    # (native dtype) plus ~6 tile-sized f32 temporaries inside the kernel body
    # (f32 gt cast, valid mask, log_g, per-key diff/keep/diff^2).
    per_row = 2 * LANE * sum(in_itemsizes) + 6 * LANE * 4
    tr = (_VMEM_WORKING_SET_BUDGET // per_row // sub) * sub
    tr = max(sub, min(_MAX_TILE_ROWS, tr))
    if n_rows < sub:
        return n_rows                      # block dim == full array dim
    return min(tr, (n_rows // sub) * sub)


def _make_silog_kernel(n_keys, max_depth, n_rows, tile_rows, nt_per_split,
                       may_be_partial):
    """Grid point (split, batch, row-tile): masked log-diff + partial sums.

    refs layout: K pred refs (1, TR, 128), gt ref (1, TR, 128),
                 s1/s2 (K, 1, 1, 128) and cnt (1, 1, 128) lane-partial outputs.
    """

    def kernel(*refs):
        pred_refs = refs[:n_keys]
        gt_ref = refs[n_keys]
        s1_ref, s2_ref, cnt_ref = refs[n_keys + 1:n_keys + 4]

        s = pl.program_id(0)
        t = pl.program_id(2)

        @pl.when(t == 0)
        def _init():
            s1_ref[...] = jnp.zeros_like(s1_ref)
            s2_ref[...] = jnp.zeros_like(s2_ref)
            cnt_ref[...] = jnp.zeros_like(cnt_ref)

        # Global row offset of this tile from the UNCLAMPED tile index (the
        # index_map clamps out-of-range tiles into bounds; the mask must not).
        row_start = (s * nt_per_split + t) * tile_rows

        def accumulate(apply_row_mask):
            g = gt_ref[...].astype(jnp.float32)                 # (1, TR, 128)
            valid = jnp.logical_and(g > 0.1, g < max_depth)
            if apply_row_mask:
                rows = jax.lax.broadcasted_iota(jnp.int32, g.shape, 1) + row_start
                valid = jnp.logical_and(valid, rows < n_rows)
            # jnp.where-based sanitize/select keeps NaN/Inf (log of padded or
            # garbage tail data, or pred<=0) out of the accumulators.
            log_g = jnp.log(jnp.where(valid, g, 1.0))
            cnt_ref[...] += jnp.sum(valid.astype(jnp.float32), axis=1,
                                    keepdims=True)
            # Static loop over keys: every key's prediction tile shares the
            # single gt tile DMA'd for this grid step.
            for k in range(n_keys):
                p = pred_refs[k][...].astype(jnp.float32)        # (1, TR, 128)
                diff = jnp.log(p) - log_g
                keep = jnp.logical_and(valid, jnp.abs(diff) > 0.001)
                diff = jnp.where(keep, diff, jnp.zeros_like(diff))
                s1_ref[k] = s1_ref[k] + jnp.sum(diff, axis=1, keepdims=True)
                s2_ref[k] = s2_ref[k] + jnp.sum(diff * diff, axis=1,
                                                keepdims=True)

        if may_be_partial:
            # Fast path: fully in-range tile, no row-mask arithmetic (VALU is
            # the first VLIW slot to saturate; this is the common case).
            @pl.when(row_start + tile_rows <= n_rows)
            def _full_tile():
                accumulate(False)

            # Partially in-range tail tile: mask by global row index.
            @pl.when(jnp.logical_and(row_start < n_rows,
                                     row_start + tile_rows > n_rows))
            def _partial_tile():
                accumulate(True)
            # Fully out-of-range (clamped duplicate) tiles of the core-split
            # axis fall through with no compute; only their duplicate DMA
            # remains (avoidable only by an even tile/split division).
        else:
            accumulate(False)

    return kernel


def _silog_reductions(pred_list, gt, max_depth, tile_rows=None, nsplit=None):
    """pred_list: K arrays [B, N]; gt: [B, N] ->
       (s1 [K, B], s2 [K, B], cnt [B]) in f32."""
    K = len(pred_list)
    B, N = gt.shape

    # Lane pad only if N is not a multiple of 128 (pred=1 -> log 0, gt=0 ->
    # invalid; both fully masked).  Typical depth-map sizes need no pad.
    pad = (-N) % LANE
    if pad:
        pred_list = [jnp.pad(p, ((0, 0), (0, pad)), constant_values=1.0)
                     for p in pred_list]
        gt = jnp.pad(gt, ((0, 0), (0, pad)), constant_values=0.0)
    R = (N + pad) // LANE

    preds3 = [p.reshape(B, R, LANE) for p in pred_list]
    gt3 = gt.reshape(B, R, LANE)

    in_dtypes = [p.dtype for p in preds3] + [gt3.dtype]
    sub = _sublane_multiple(in_dtypes)
    itemsizes = [jnp.dtype(dt).itemsize for dt in in_dtypes]

    if R < sub:
        tile_rows = R
    elif tile_rows is None:
        tile_rows = _choose_tile_rows(R, itemsizes, sub)
    else:
        tile_rows = max(sub, (int(tile_rows) // sub) * sub)
        tile_rows = min(tile_rows, (R // sub) * sub)

    nt_total = _cdiv(R, tile_rows)

    # Synthetic core-split axis: only worthwhile on multi-TensorCore chips
    # (v7x) when the batch grid axis alone cannot feed both cores.
    if nsplit is None:
        n_cores = _num_tensorcores()
        nsplit = n_cores if (n_cores > 1 and B < n_cores
                             and nt_total >= n_cores) else 1
    nsplit = max(1, min(int(nsplit), nt_total))
    ntps = _cdiv(nt_total, nsplit)
    may_be_partial = (nsplit * ntps * tile_rows != R)

    def tile_idx(s, t):
        # Clamp out-of-range tiles of the split axis into bounds; the kernel
        # skips their compute based on the unclamped row offset.
        return jnp.minimum(s * ntps + t, nt_total - 1)

    in_map = lambda s, b, t: (b, tile_idx(s, t), 0)

    kern = _make_silog_kernel(K, float(max_depth), R, tile_rows, ntps,
                              may_be_partial)

    out_shape = (
        jax.ShapeDtypeStruct((K, nsplit * B, 1, LANE), jnp.float32),
        jax.ShapeDtypeStruct((K, nsplit * B, 1, LANE), jnp.float32),
        jax.ShapeDtypeStruct((nsplit * B, 1, LANE), jnp.float32),
    )

    s1, s2, cnt = pl.pallas_call(
        kern,
        out_shape=out_shape,
        grid_spec=pltpu.PrefetchScalarGridSpec(
            num_scalar_prefetch=0,
            grid=(nsplit, B, ntps),
            in_specs=(
                [pl.BlockSpec((1, tile_rows, LANE), in_map) for _ in range(K)]
                + [pl.BlockSpec((1, tile_rows, LANE), in_map)]),
            out_specs=[
                pl.BlockSpec((K, 1, 1, LANE), lambda s, b, t: (0, s * B + b, 0, 0)),
                pl.BlockSpec((K, 1, 1, LANE), lambda s, b, t: (0, s * B + b, 0, 0)),
                pl.BlockSpec((1, 1, LANE), lambda s, b, t: (s * B + b, 0, 0)),
            ],
        ),
        compiler_params=pltpu.CompilerParams(
            dimension_semantics=("parallel", "parallel", "arbitrary"),
            vmem_limit_bytes=_VMEM_LIMIT_BYTES),
    )(*preds3, gt3)

    # Tiny final reductions (split axis + lanes) in plain JAX.
    s1 = s1.reshape(K, nsplit, B, LANE).sum(axis=(1, 3))
    s2 = s2.reshape(K, nsplit, B, LANE).sum(axis=(1, 3))
    cnt = cnt.reshape(nsplit, B, LANE).sum(axis=(0, 2))
    return s1, s2, cnt


def silog_loss(feat, gts, si_loss_lambda, max_depth, tile_rows=None, nsplit=None):
    """Forward pass of SILogLoss. `feat` is a dict of NCHW predictions."""
    if not feat:
        return jnp.float32(0.0)

    B = gts.shape[0]
    total_pixels = int(gts.shape[1] * gts.shape[2] * gts.shape[3])

    # Align each prediction with the raw gt layout by pixel-shuffling it (the
    # exact inverse of pixel-unshuffling gt); the per-batch reductions are
    # permutation invariant so the result is identical, and a single gt tensor
    # is shared by every key inside the kernel.  Each prediction is its own
    # pallas_call input so no jnp.stack concat copy is materialized.
    pred_list = []
    for key in feat:
        pred = feat[key]
        r = int(round(math.sqrt(pred.shape[1])))
        pred_list.append(pixel_shuffle(pred, r).reshape(B, -1))
    gt_flat = gts.reshape(B, -1)

    s1, s2, cnt = _silog_reductions(pred_list, gt_flat, max_depth,
                                    tile_rows, nsplit)

    num_pixels = cnt + 1e-6                                     # [B]
    loss1 = s2 / num_pixels - si_loss_lambda * (s1 / num_pixels) ** 2   # [K, B]
    weight = num_pixels / jnp.float32(total_pixels)                     # [B]
    return jnp.sum(loss1 * weight)


def _silog_loss_ref(feat, gts, si_loss_lambda, max_depth):
    """Pure-JAX reference mirroring the PyTorch code (for correctness check)."""
    loss = jnp.float32(0.0)
    for key in feat:
        pred = feat[key].astype(jnp.float32)
        scale_factor = int(round(math.sqrt(pred.shape[1])))
        gt = pixel_unshuffle(gts, scale_factor).astype(jnp.float32)
        diff = jnp.log(pred) - jnp.log(gt)
        valid = (gt > 0.1) & (gt < max_depth)
        diff = jnp.where(valid & (jnp.abs(diff) > 0.001), diff, jnp.zeros_like(diff))
        diff = diff.reshape(diff.shape[0], -1)
        num_pixels = valid.reshape(valid.shape[0], -1).sum(axis=-1) + 1e-6
        loss1 = (diff ** 2).sum(axis=-1) / num_pixels
        loss1 = loss1 - si_loss_lambda * (diff.sum(axis=-1) / num_pixels) ** 2
        total_pixels = gt.shape[1] * gt.shape[2] * gt.shape[3]
        weight = num_pixels / total_pixels
        loss = loss + jnp.sum(loss1 * weight)
    return loss


if __name__ == "__main__":
    key = jax.random.PRNGKey(0)
    ks = jax.random.split(key, 12)

    SI_LOSS_LAMBDA = 0.85
    MAX_DEPTH = 10.0

    # --- Test 1: small shapes, auto-sized row tile (single full tile).
    gts = jax.random.uniform(ks[0], (2, 1, 32, 32), jnp.float32, 0.05, 12.0)
    feat = {
        "scale2": jax.random.uniform(ks[1], (2, 4, 16, 16), jnp.float32, 0.5, 10.0),
        "scale4": jax.random.uniform(ks[2], (2, 16, 8, 8), jnp.float32, 0.5, 10.0),
    }
    out = jax.block_until_ready(silog_loss(feat, gts, SI_LOSS_LAMBDA, MAX_DEPTH))
    ref = jax.block_until_ready(_silog_loss_ref(feat, gts, SI_LOSS_LAMBDA, MAX_DEPTH))
    assert jnp.allclose(out, ref, rtol=1e-4, atol=1e-5), (out, ref)

    # --- Test 2: forced small tile -> multiple row tiles + masked partial tail.
    gts2 = jax.random.uniform(ks[3], (2, 1, 64, 80), jnp.float32, 0.05, 12.0)
    feat2 = {
        "scale2": jax.random.uniform(ks[4], (2, 4, 32, 40), jnp.float32, 0.5, 10.0),
        "scale4": jax.random.uniform(ks[5], (2, 16, 16, 20), jnp.float32, 0.5, 10.0),
    }
    out2 = jax.block_until_ready(
        silog_loss(feat2, gts2, SI_LOSS_LAMBDA, MAX_DEPTH, tile_rows=16))
    ref2 = jax.block_until_ready(
        _silog_loss_ref(feat2, gts2, SI_LOSS_LAMBDA, MAX_DEPTH))
    assert jnp.allclose(out2, ref2, rtol=1e-4, atol=1e-5), (out2, ref2)

    # --- Test 3: forced 2-way core split at B == 1 (uneven split -> clamped
    # duplicate tile whose compute is skipped, plus a masked tail tile).
    gts3 = jax.random.uniform(ks[6], (1, 1, 64, 80), jnp.float32, 0.05, 12.0)
    feat3 = {
        "scale2": jax.random.uniform(ks[7], (1, 4, 32, 40), jnp.float32, 0.5, 10.0),
        "scale4": jax.random.uniform(ks[8], (1, 16, 16, 20), jnp.float32, 0.5, 10.0),
    }
    out3 = jax.block_until_ready(
        silog_loss(feat3, gts3, SI_LOSS_LAMBDA, MAX_DEPTH, tile_rows=16, nsplit=2))
    ref3 = jax.block_until_ready(
        _silog_loss_ref(feat3, gts3, SI_LOSS_LAMBDA, MAX_DEPTH))
    assert jnp.allclose(out3, ref3, rtol=1e-4, atol=1e-5), (out3, ref3)

    # --- Test 4: bf16 inputs (halved HBM traffic path, 16-row sublane rounding).
    gts4 = jax.random.uniform(ks[9], (2, 1, 64, 64), jnp.float32, 0.05, 12.0
                              ).astype(jnp.bfloat16)
    feat4 = {
        "scale2": jax.random.uniform(ks[10], (2, 4, 32, 32), jnp.float32, 0.5, 10.0
                                     ).astype(jnp.bfloat16),
        "scale4": jax.random.uniform(ks[11], (2, 16, 16, 16), jnp.float32, 0.5, 10.0
                                     ).astype(jnp.bfloat16),
    }
    out4 = jax.block_until_ready(silog_loss(feat4, gts4, SI_LOSS_LAMBDA, MAX_DEPTH))
    ref4 = jax.block_until_ready(_silog_loss_ref(feat4, gts4, SI_LOSS_LAMBDA, MAX_DEPTH))
    assert jnp.allclose(out4, ref4, rtol=1e-3, atol=1e-4), (out4, ref4)

    print("KERNEL_OK")
</pallas_src>

<mosaic_0001>
module attributes {stable_mosaic.version = 11 : i64} {
  func.func @kernel(%arg0: i32, %arg1: i32, %arg2: i32, %arg3: memref<1x8x128xf32, #tpu.memory_space<vmem>>, %arg4: memref<1x8x128xf32, #tpu.memory_space<vmem>>, %arg5: memref<1x8x128xf32, #tpu.memory_space<vmem>>, %arg6: memref<2x1x1x128xf32, #tpu.memory_space<vmem>>, %arg7: memref<2x1x1x128xf32, #tpu.memory_space<vmem>>, %arg8: memref<1x1x128xf32, #tpu.memory_space<vmem>>) attributes {dimension_semantics = [#tpu.dimension_semantics<parallel>, #tpu.dimension_semantics<parallel>, #tpu.dimension_semantics<arbitrary>], iteration_bounds = array<i64: 1, 2, 1>, scalar_prefetch = 0 : i64, scratch_operands = 0 : i64, tpu.core_type = #tpu.core_type<tc>, window_params = [{transform_indices = @transform_0, window_bounds = array<i64: 1, 8, 128>}, {transform_indices = @transform_1, window_bounds = array<i64: 1, 8, 128>}, {transform_indices = @transform_2, window_bounds = array<i64: 1, 8, 128>}, {transform_indices = @transform_3, window_bounds = array<i64: 2, 1, 1, 128>}, {transform_indices = @transform_4, window_bounds = array<i64: 2, 1, 1, 128>}, {transform_indices = @transform_5, window_bounds = array<i64: 1, 1, 128>}]} {
    %c0_i32 = arith.constant 0 : i32
    %0 = arith.cmpi eq, %arg2, %c0_i32 : i32
    %1 = arith.extui %0 : i1 to i32
    %c0_i32_0 = arith.constant 0 : i32
    %2 = arith.cmpi ne, %1, %c0_i32_0 : i32
    scf.if %2 {
      %cst_57 = arith.constant 0.000000e+00 : f32
      %71 = vector.broadcast %cst_57 : f32 to vector<2x1x1x128xf32>
      %c0_58 = arith.constant 0 : index
      %c0_59 = arith.constant 0 : index
      %c0_60 = arith.constant 0 : index
      %c0_61 = arith.constant 0 : index
      %72 = vector.load %arg6[%c0_58, %c0_59, %c0_60, %c0_61] : memref<2x1x1x128xf32, #tpu.memory_space<vmem>>, vector<2x1x1x128xf32>
      tpu.vector_store %arg6[%c0_58, %c0_59, %c0_60, %c0_61], %71 {strides = array<i32>} : memref<2x1x1x128xf32, #tpu.memory_space<vmem>>, vector<2x1x1x128xf32>,
      %cst_62 = arith.constant 0.000000e+00 : f32
      %73 = vector.broadcast %cst_62 : f32 to vector<2x1x1x128xf32>
      %c0_63 = arith.constant 0 : index
      %c0_64 = arith.constant 0 : index
      %c0_65 = arith.constant 0 : index
      %c0_66 = arith.constant 0 : index
      %74 = vector.load %arg7[%c0_63, %c0_64, %c0_65, %c0_66] : memref<2x1x1x128xf32, #tpu.memory_space<vmem>>, vector<2x1x1x128xf32>
      tpu.vector_store %arg7[%c0_63, %c0_64, %c0_65, %c0_66], %73 {strides = array<i32>} : memref<2x1x1x128xf32, #tpu.memory_space<vmem>>, vector<2x1x1x128xf32>,
      %cst_67 = arith.constant 0.000000e+00 : f32
      %75 = vector.broadcast %cst_67 : f32 to vector<1x1x128xf32>
      %c0_68 = arith.constant 0 : index
      %c0_69 = arith.constant 0 : index
      %c0_70 = arith.constant 0 : index
      %76 = vector.load %arg8[%c0_68, %c0_69, %c0_70] : memref<1x1x128xf32, #tpu.memory_space<vmem>>, vector<1x1x128xf32>
      tpu.vector_store %arg8[%c0_68, %c0_69, %c0_70], %75 {strides = array<i32>} : memref<1x1x128xf32, #tpu.memory_space<vmem>>, vector<1x1x128xf32>,
    } else {
    }
    %c0 = arith.constant 0 : index
    %c0_1 = arith.constant 0 : index
    %c0_2 = arith.constant 0 : index
    %3 = vector.load %arg5[%c0, %c0_1, %c0_2] : memref<1x8x128xf32, #tpu.memory_space<vmem>>, vector<1x8x128xf32>
    %cst = arith.constant 1.000000e-01 : f32
    %4 = vector.broadcast %cst : f32 to vector<1x8x128xf32>
    %5 = arith.cmpf ogt, %3, %4 : vector<1x8x128xf32>
    %cst_3 = arith.constant 1.000000e+01 : f32
    %6 = vector.broadcast %cst_3 : f32 to vector<1x8x128xf32>
    %7 = arith.cmpf olt, %3, %6 : vector<1x8x128xf32>
    %8 = arith.andi %5, %7 : vector<1x8x128xi1>
    %cst_4 = arith.constant 1.000000e+00 : f32
    %9 = vector.broadcast %cst_4 : f32 to vector<1x8x128xf32>
    %10 = arith.select %8, %3, %9 : vector<1x8x128xi1>, vector<1x8x128xf32>
    %11 = math.log %10 : vector<1x8x128xf32>
    %c0_5 = arith.constant 0 : index
    %c0_6 = arith.constant 0 : index
    %c0_7 = arith.constant 0 : index
    %12 = vector.load %arg8[%c0_5, %c0_6, %c0_7] : memref<1x1x128xf32, #tpu.memory_space<vmem>>, vector<1x1x128xf32>
    %13 = arith.extui %8 : vector<1x8x128xi1> to vector<1x8x128xi32>
    %14 = arith.sitofp %13 : vector<1x8x128xi32> to vector<1x8x128xf32>
    %cst_8 = arith.constant dense<0.000000e+00> : vector<1x128xf32>
    %15 = vector.multi_reduction <add>, %14, %cst_8 [1] : vector<1x8x128xf32> to vector<1x128xf32>
    %16 = vector.shape_cast %15 : vector<1x128xf32> to vector<1x1x128xf32>
    %17 = arith.addf %12, %16 : vector<1x1x128xf32>
    %c0_9 = arith.constant 0 : index
    %c0_10 = arith.constant 0 : index
    %c0_11 = arith.constant 0 : index
    %18 = vector.load %arg8[%c0_9, %c0_10, %c0_11] : memref<1x1x128xf32, #tpu.memory_space<vmem>>, vector<1x1x128xf32>
    tpu.vector_store %arg8[%c0_9, %c0_10, %c0_11], %17 {strides = array<i32>} : memref<1x1x128xf32, #tpu.memory_space<vmem>>, vector<1x1x128xf32>,
    %c0_12 = arith.constant 0 : index
    %c0_13 = arith.constant 0 : index
    %c0_14 = arith.constant 0 : index
    %19 = vector.load %arg3[%c0_12, %c0_13, %c0_14] : memref<1x8x128xf32, #tpu.memory_space<vmem>>, vector<1x8x128xf32>
    %20 = math.log %19 : vector<1x8x128xf32>
    %21 = arith.subf %20, %11 : vector<1x8x128xf32>
    %22 = math.absf %21 : vector<1x8x128xf32>
    %cst_15 = arith.constant 1.000000e-03 : f32
    %23 = vector.broadcast %cst_15 : f32 to vector<1x8x128xf32>
    %24 = arith.cmpf ogt, %22, %23 : vector<1x8x128xf32>
    %25 = arith.andi %8, %24 : vector<1x8x128xi1>
    %cst_16 = arith.constant 0.000000e+00 : f32
    %26 = vector.broadcast %cst_16 : f32 to vector<1x8x128xf32>
    %27 = arith.select %25, %21, %26 : vector<1x8x128xi1>, vector<1x8x128xf32>
    %c0_17 = arith.constant 0 : index
    %c0_18 = arith.constant 0 : index
    %c0_19 = arith.constant 0 : index
    %c0_20 = arith.constant 0 : index
    %28 = vector.load %arg6[%c0_17, %c0_18, %c0_19, %c0_20] : memref<2x1x1x128xf32, #tpu.memory_space<vmem>>, vector<1x1x1x128xf32>
    %29 = vector.shape_cast %28 : vector<1x1x1x128xf32> to vector<1x1x128xf32>
    %cst_21 = arith.constant dense<0.000000e+00> : vector<1x128xf32>
    %30 = vector.multi_reduction <add>, %27, %cst_21 [1] : vector<1x8x128xf32> to vector<1x128xf32>
    %31 = vector.shape_cast %30 : vector<1x128xf32> to vector<1x1x128xf32>
    %32 = arith.addf %29, %31 : vector<1x1x128xf32>
    %c0_22 = arith.constant 0 : index
    %c0_23 = arith.constant 0 : index
    %c0_24 = arith.constant 0 : index
    %c0_25 = arith.constant 0 : index
    %33 = vector.load %arg6[%c0_22, %c0_23, %c0_24, %c0_25] : memref<2x1x1x128xf32, #tpu.memory_space<vmem>>, vector<1x1x1x128xf32>
    %34 = vector.shape_cast %33 : vector<1x1x1x128xf32> to vector<1x1x128xf32>
    %35 = vector.shape_cast %32 : vector<1x1x128xf32> to vector<1x1x1x128xf32>
    tpu.vector_store %arg6[%c0_22, %c0_23, %c0_24, %c0_25], %35 {strides = array<i32>} : memref<2x1x1x128xf32, #tpu.memory_space<vmem>>, vector<1x1x1x128xf32>,
    %c0_26 = arith.constant 0 : index
    %c0_27 = arith.constant 0 : index
    %c0_28 = arith.constant 0 : index
    %c0_29 = arith.constant 0 : index
    %36 = vector.load %arg7[%c0_26, %c0_27, %c0_28, %c0_29] : memref<2x1x1x128xf32, #tpu.memory_space<vmem>>, vector<1x1x1x128xf32>
    %37 = vector.shape_cast %36 : vector<1x1x1x128xf32> to vector<1x1x128xf32>
    %38 = arith.mulf %27, %27 : vector<1x8x128xf32>
    %cst_30 = arith.constant dense<0.000000e+00> : vector<1x128xf32>
    %39 = vector.multi_reduction <add>, %38, %cst_30 [1] : vector<1x8x128xf32> to vector<1x128xf32>
    %40 = vector.shape_cast %39 : vector<1x128xf32> to vector<1x1x128xf32>
    %41 = arith.addf %37, %40 : vector<1x1x128xf32>
    %c0_31 = arith.constant 0 : index
    %c0_32 = arith.constant 0 : index
    %c0_33 = arith.constant 0 : index
    %c0_34 = arith.constant 0 : index
    %42 = vector.load %arg7[%c0_31, %c0_32, %c0_33, %c0_34] : memref<2x1x1x128xf32, #tpu.memory_space<vmem>>, vector<1x1x1x128xf32>
    %43 = vector.shape_cast %42 : vector<1x1x1x128xf32> to vector<1x1x128xf32>
    %44 = vector.shape_cast %41 : vector<1x1x128xf32> to vector<1x1x1x128xf32>
    tpu.vector_store %arg7[%c0_31, %c0_32, %c0_33, %c0_34], %44 {strides = array<i32>} : memref<2x1x1x128xf32, #tpu.memory_space<vmem>>, vector<1x1x1x128xf32>,
    %c0_35 = arith.constant 0 : index
    %c0_36 = arith.constant 0 : index
    %c0_37 = arith.constant 0 : index
    %45 = vector.load %arg4[%c0_35, %c0_36, %c0_37] : memref<1x8x128xf32, #tpu.memory_space<vmem>>, vector<1x8x128xf32>
    %46 = math.log %45 : vector<1x8x128xf32>
    %47 = arith.subf %46, %11 : vector<1x8x128xf32>
    %48 = math.absf %47 : vector<1x8x128xf32>
    %cst_38 = arith.constant 1.000000e-03 : f32
    %49 = vector.broadcast %cst_38 : f32 to vector<1x8x128xf32>
    %50 = arith.cmpf ogt, %48, %49 : vector<1x8x128xf32>
    %51 = arith.andi %8, %50 : vector<1x8x128xi1>
    %cst_39 = arith.constant 0.000000e+00 : f32
    %52 = vector.broadcast %cst_39 : f32 to vector<1x8x128xf32>
    %53 = arith.select %51, %47, %52 : vector<1x8x128xi1>, vector<1x8x128xf32>
    %c1 = arith.constant 1 : index
    %c0_40 = arith.constant 0 : index
    %c0_41 = arith.constant 0 : index
    %c0_42 = arith.constant 0 : index
    %54 = vector.load %arg6[%c1, %c0_40, %c0_41, %c0_42] : memref<2x1x1x128xf32, #tpu.memory_space<vmem>>, vector<1x1x1x128xf32>
    %55 = vector.shape_cast %54 : vector<1x1x1x128xf32> to vector<1x1x128xf32>
    %cst_43 = arith.constant dense<0.000000e+00> : vector<1x128xf32>
    %56 = vector.multi_reduction <add>, %53, %cst_43 [1] : vector<1x8x128xf32> to vector<1x128xf32>
    %57 = vector.shape_cast %56 : vector<1x128xf32> to vector<1x1x128xf32>
    %58 = arith.addf %55, %57 : vector<1x1x128xf32>
    %c1_44 = arith.constant 1 : index
    %c0_45 = arith.constant 0 : index
    %c0_46 = arith.constant 0 : index
    %c0_47 = arith.constant 0 : index
    %59 = vector.load %arg6[%c1_44, %c0_45, %c0_46, %c0_47] : memref<2x1x1x128xf32, #tpu.memory_space<vmem>>, vector<1x1x1x128xf32>
    %60 = vector.shape_cast %59 : vector<1x1x1x128xf32> to vector<1x1x128xf32>
    %61 = vector.shape_cast %58 : vector<1x1x128xf32> to vector<1x1x1x128xf32>
    tpu.vector_store %arg6[%c1_44, %c0_45, %c0_46, %c0_47], %61 {strides = array<i32>} : memref<2x1x1x128xf32, #tpu.memory_space<vmem>>, vector<1x1x1x128xf32>,
    %c1_48 = arith.constant 1 : index
    %c0_49 = arith.constant 0 : index
    %c0_50 = arith.constant 0 : index
    %c0_51 = arith.constant 0 : index
    %62 = vector.load %arg7[%c1_48, %c0_49, %c0_50, %c0_51] : memref<2x1x1x128xf32, #tpu.memory_space<vmem>>, vector<1x1x1x128xf32>
    %63 = vector.shape_cast %62 : vector<1x1x1x128xf32> to vector<1x1x128xf32>
    %64 = arith.mulf %53, %53 : vector<1x8x128xf32>
    %cst_52 = arith.constant dense<0.000000e+00> : vector<1x128xf32>
    %65 = vector.multi_reduction <add>, %64, %cst_52 [1] : vector<1x8x128xf32> to vector<1x128xf32>
    %66 = vector.shape_cast %65 : vector<1x128xf32> to vector<1x1x128xf32>
    %67 = arith.addf %63, %66 : vector<1x1x128xf32>
    %c1_53 = arith.constant 1 : index
    %c0_54 = arith.constant 0 : index
    %c0_55 = arith.constant 0 : index
    %c0_56 = arith.constant 0 : index
    %68 = vector.load %arg7[%c1_53, %c0_54, %c0_55, %c0_56] : memref<2x1x1x128xf32, #tpu.memory_space<vmem>>, vector<1x1x1x128xf32>
    %69 = vector.shape_cast %68 : vector<1x1x1x128xf32> to vector<1x1x128xf32>
    %70 = vector.shape_cast %67 : vector<1x1x128xf32> to vector<1x1x1x128xf32>
    tpu.vector_store %arg7[%c1_53, %c0_54, %c0_55, %c0_56], %70 {strides = array<i32>} : memref<2x1x1x128xf32, #tpu.memory_space<vmem>>, vector<1x1x1x128xf32>,
    return
  }
  func.func @transform_0(%arg0: i32, %arg1: i32, %arg2: i32) -> (i32, i32, i32) {
    %c1_i32 = arith.constant 1 : i32
    %0 = arith.muli %arg0, %c1_i32 : i32
    %1 = arith.addi %0, %arg2 : i32
    %c0_i32 = arith.constant 0 : i32
    %2 = arith.minsi %1, %c0_i32 : i32
    %c0_i32_0 = arith.constant 0 : i32
    %c0_i32_1 = arith.constant 0 : i32
    return %arg1, %2, %c0_i32_0 : i32, i32, i32
  }
  func.func @transform_1(%arg0: i32, %arg1: i32, %arg2: i32) -> (i32, i32, i32) {
    %c1_i32 = arith.constant 1 : i32
    %0 = arith.muli %arg0, %c1_i32 : i32
    %1 = arith.addi %0, %arg2 : i32
    %c0_i32 = arith.constant 0 : i32
    %2 = arith.minsi %1, %c0_i32 : i32
    %c0_i32_0 = arith.constant 0 : i32
    %c0_i32_1 = arith.constant 0 : i32
    return %arg1, %2, %c0_i32_0 : i32, i32, i32
  }
  func.func @transform_2(%arg0: i32, %arg1: i32, %arg2: i32) -> (i32, i32, i32) {
    %c1_i32 = arith.constant 1 : i32
    %0 = arith.muli %arg0, %c1_i32 : i32
    %1 = arith.addi %0, %arg2 : i32
    %c0_i32 = arith.constant 0 : i32
    %2 = arith.minsi %1, %c0_i32 : i32
    %c0_i32_0 = arith.constant 0 : i32
    %c0_i32_1 = arith.constant 0 : i32
    return %arg1, %2, %c0_i32_0 : i32, i32, i32
  }
  func.func @transform_3(%arg0: i32, %arg1: i32, %arg2: i32) -> (i32, i32, i32, i32) {
    %c2_i32 = arith.constant 2 : i32
    %0 = arith.muli %arg0, %c2_i32 : i32
    %1 = arith.addi %0, %arg1 : i32
    %c0_i32 = arith.constant 0 : i32
    %c0_i32_0 = arith.constant 0 : i32
    %c0_i32_1 = arith.constant 0 : i32
    %c0_i32_2 = arith.constant 0 : i32
    return %c0_i32, %1, %c0_i32_0, %c0_i32_1 : i32, i32, i32, i32
  }
  func.func @transform_4(%arg0: i32, %arg1: i32, %arg2: i32) -> (i32, i32, i32, i32) {
    %c2_i32 = arith.constant 2 : i32
    %0 = arith.muli %arg0, %c2_i32 : i32
    %1 = arith.addi %0, %arg1 : i32
    %c0_i32 = arith.constant 0 : i32
    %c0_i32_0 = arith.constant 0 : i32
    %c0_i32_1 = arith.constant 0 : i32
    %c0_i32_2 = arith.constant 0 : i32
    return %c0_i32, %1, %c0_i32_0, %c0_i32_1 : i32, i32, i32, i32
  }
  func.func @transform_5(%arg0: i32, %arg1: i32, %arg2: i32) -> (i32, i32, i32) {
    %c2_i32 = arith.constant 2 : i32
    %0 = arith.muli %arg0, %c2_i32 : i32
    %1 = arith.addi %0, %arg1 : i32
    %c0_i32 = arith.constant 0 : i32
    %c0_i32_0 = arith.constant 0 : i32
    %c0_i32_1 = arith.constant 0 : i32
    return %1, %c0_i32, %c0_i32_0 : i32, i32, i32
  }
}

</mosaic_0001>

<bundles_post_ra>
// kernel: tpu_custom_call.1
= control target key start
LH: loop header
LB: loop body
LE: loop exit
PB: predicated region body
PF: predicated region fallthrough
CT: control target
= control target key end

     0   :  { %s1444_s0 = inlined_call_operand.hbm [shape: f32[2,8,128], index: 0, kind: input, shape index: {}]   ;;  %s1445_s1 = inlined_call_operand.hbm [shape: f32[2,8,128], index: 1, kind: input, shape index: {}]   ;;  %s1446_s2 = inlined_call_operand.hbm [shape: f32[2,8,128], index: 2, kind: input, shape index: {}]   ;;  %s1447_s3 = inlined_call_operand.hbm [shape: f32[2,2,1,128], index: 3, kind: output, shape index: {0}]   ;;  %s1448_s4 = inlined_call_operand.hbm [shape: f32[2,2,1,128], index: 4, kind: output, shape index: {1}]   ;;  %s1449_s5 = inlined_call_operand.hbm [shape: f32[2,1,128], index: 5, kind: output, shape index: {2}]  }
   0x1   :  { %1456 = sst [smem:[#allocation20_spill]] %s1445_s1 }
   0x2   :  { %11 = vsyncpa [#allocation3], 0 }
   0x3   :  { %13 = vsyncpa [#allocation3 + $0x1], 0 }
   0x4   :  { %14 = vsyncpa [#allocation6], 0 }
   0x5   :  { %16 = vsyncpa [#allocation6 + $0x1], 0 }
   0x6   :  { %17 = vsyncpa [#allocation4], 0 }
   0x7   :  { %19 = vsyncpa [#allocation4 + $0x1], 0 }
   0x8   :  { %20 = vsyncpa [#allocation10], 0 }
   0x9   :  { %22 = vsyncpa [#allocation10 + $0x1], 0  ;;  %s1128_s18 = smov 0   ;;  %s1130_s19 = smov 0  }
   0xa   :  { %s1132_s20 = smov 0   ;;  %s1134_s21 = smov 0  }
   0xb   :  { %s1136_s22 = smov 0   ;;  %s1138_s23 = smov 0  }
   0xc LB: > { %1457 = sst [smem:[#allocation16_spill]] %s1082_s22  ;;  %s1159_s24 = sadd.s32 4294967295, %s1086_s23   ;;  %s1086_s23 = sphi %s1138_s23, %s28_s23   ;;  %s1082_s22 = sphi %s1136_s22, %s1480_s22   ;;  %s1078_s21 = sphi %s1134_s21, %s1475_s21   ;;  %s1074_s20 = sphi %s1132_s20, %s1479_s20   ;;  %s1070_s19 = sphi %s1130_s19, %s1478_s19   ;;  %s1066_s18 = sphi %s1128_s18, %s1477_s18  }
   0xd   : > { %1458 = sst [smem:[#allocation17_spill]] %s1086_s23  ;;  %s1450_s25 = sadd.s32 4294967294, %s1086_s23  }
   0xe   : > { %s43_s26 = sadd.s32 1, %s1082_s22  ;;  %s62_s27 = sadd.s32 1, %s1074_s20 }
   0xf   : > { %p45_p0 = scmp.ge.s32.totalorder %s43_s26, 2  ;;  %p69_p1 = scmp.ne.s32.totalorder %s1074_s20, %s1070_s19 }
  0x10   : > { %p70_p2 = scmp.eq.s32.totalorder %s1086_s23, 0  ;;  %p75_p3 = scmp.ne.s32.totalorder %s1070_s19, %s1066_s18 }
  0x11   : > { %s1482_s26 = smov (%p45_p0, %s43_s26), 0  ;;  %p76_p5 = scmp.eq.s32.totalorder %s1159_s24, 0 }
  0x12   : > { %1459 = sst [smem:[#allocation18_spill]] %s1482_s26  ;;  %p1171_p4 = por %p70_p2, %p69_p1 }
  0x13   : > { %s57_s29 = ssub.s32 %s1082_s22, %s1482_s26  ;;  %p171_p6 = scmp.eq.s32.totalorder %s1159_s24, 1 }
  0x14   : > { %p60_p7 = scmp.eq.s32.totalorder %s57_s29, 0  ;;  %p1179_p8 = por %p76_p5, %p75_p3 }
  0x15   : > { %p1183_p9 = por %p171_p6, %p69_p1  ;;  %p177_p10 = scmp.eq.s32.totalorder %s1450_s25, 1 }
  0x16   : > { %s1190_s7 = scalar_select %p60_p7, %s1074_s20, %s62_s27  }
  0x17   : > { %p1192_p11 = por %p177_p10, %p75_p3  ;;  %p802_p13 = scmp.lt.s32.totalorder %s1086_s23, 2 }
  0x18   : > { %1463 = sst [smem:[#allocation19_spill]] %s1190_s7  ;;  %s1451_s9 = sand.u32 1, %s1074_s20  }
  0x19   : > { %s1201_s10 = sshll.u32 %s1451_s9, 3  ;;  %s1204_s11 = sshll.u32 %s1082_s22, 7 }
  0x1a   : > { %p1208_p0 = pnand %p802_p13, %p1171_p4  ;;  %s279_s13 = sand.u32 1, %s1086_s23  }
  0x1b   : > { %s1466_s1 = sld [smem:[#allocation20_spill]]  ;;  %s283_s17 = scalar_lea.vmem [#allocation5], %s1201_s10 }
  0x1c   : > { %s294_s27 = sshll.u32 %s283_s17, 4  ;;  %p752_p1 = scmp.ge.s32.totalorder %s1086_s23, 1  ;;  %s295_s27 = int_to_ptr.vmem [resolvable:$true] %s294_s27 }
  0x1d   : > { %p321_p2 = scmp.lt.s32.totalorder %s1086_s23, 3  ;;  %s1220_s29 = scalar_lea.sflag [#allocation6], %s279_s13 }
  0x1e   : > { %p864_p3 = pneg %p1208_p0  ;;  %s875_s28 = scalar_lea.vmem %s295_s27, 128 }
  0x1f   : > { %p876_p4 = scmp.ne.s32.totalorder %s295_s27, %s875_s28  ;;  %s1088_s25 = smov [#allocation5]  }
  0x20   : > { %s880_s9 = sshll.u32 %s1088_s25, 4  ;;  %s881_s9 = int_to_ptr.vmem [resolvable:$false] %s880_s9 }
  0x21   : > { %s292_s16 = scalar_lea.hbm %s1466_s1, %s1204_s11  ;;  %p878_p5 = pnand %p876_p4, %p864_p3 }
  0x22   : > { %s882_s14 = scalar_lea.vmem %s881_s9, 256  ;;  %p883_p7 = scmp.lt.s32.totalorder %s295_s27, %s881_s9 }
  0x23   : > { %p879_p6 = pneg %p878_p5  ;;  %p884_p10 = scmp.lt.s32.totalorder %s882_s14, %s875_s28 }
  0x25   : > { %p885_p13 = por %p884_p10, %p883_p7 }
  0x27   : > { %p886_p12 = pnand %p885_p13, %p879_p6 }
  0x29   : > { %889 = shalt.err (!%p886_p12)
}
  0x2a   : > { %788 = dma.hbm_to_vmem [thread:$0]  (!%p1208_p0), %s292_s16, 128, %s295_s27, %s1220_s29  }
  0x2b   : > { %p1234_p4 = pnand %p752_p1, %p321_p2  ;;  %s270_s15 = scalar_lea.hbm %s1444_s0, %s1204_s11 }
  0x2c   : > { %s261_s17 = scalar_lea.vmem [#allocation2], %s1201_s10  ;;  %s314_s26 = scalar_lea.hbm %s1446_s2, %s1204_s11 }
  0x2d   : > { %s272_s28 = sshll.u32 %s261_s17, 4  ;;  %s1468_s22 = sand.u32 1, %s1074_s20   ;;  %s273_s28 = int_to_ptr.vmem [resolvable:$true] %s272_s28 }
  0x2e   : > { %s258_s7 = scalar_lea.sflag [#allocation3], %s1468_s22  ;;  %s903_s16 = scalar_lea.vmem %s273_s28, 128 }
  0x2f   : > { %p904_p12 = scmp.ne.s32.totalorder %s273_s28, %s903_s16  ;;  %s1089_s27 = smov [#allocation2]  }
  0x30   : > { %s908_s23 = sshll.u32 %s1089_s27, 4  ;;  %s909_s23 = int_to_ptr.vmem [resolvable:$false] %s908_s23 }
  0x31   : > { %p906_p1 = pnand %p904_p12, %p864_p3  ;;  %s910_s9 = scalar_lea.vmem %s909_s23, 256 }
  0x32   : > { %p911_p5 = scmp.lt.s32.totalorder %s273_s28, %s909_s23  ;;  %p912_p6 = scmp.lt.s32.totalorder %s910_s9, %s903_s16 }
  0x33   : > { %p907_p2 = pneg %p906_p1 }
  0x34   : > { %p913_p7 = por %p912_p6, %p911_p5 }
  0x36   : > { %p914_p10 = pnand %p913_p7, %p907_p2 }
  0x38   : > { %917 = shalt.err (!%p914_p10)
}
  0x39   : > { %785 = dma.hbm_to_vmem [thread:$0]  (!%p1208_p0), %s270_s15, 128, %s273_s28, %s258_s7  }
  0x3a   : > { %s305_s1 = scalar_lea.vmem [#allocation7], %s1201_s10  ;;  %s1090_s17 = smov [#allocation7]  }
  0x3b   : > { %s316_s22 = sshll.u32 %s305_s1, 4  ;;  %s936_s23 = sshll.u32 %s1090_s17, 4  ;;  %s317_s22 = int_to_ptr.vmem [resolvable:$true] %s316_s22  ;;  %s937_s23 = int_to_ptr.vmem [resolvable:$false] %s936_s23 }
  0x3c   : > { %s931_s13 = scalar_lea.vmem %s317_s22, 128  ;;  %s938_s14 = scalar_lea.vmem %s937_s23, 256 }
  0x3d   : > { %p932_p13 = scmp.ne.s32.totalorder %s317_s22, %s931_s13  ;;  %p939_p2 = scmp.lt.s32.totalorder %s317_s22, %s937_s23 }
  0x3e   : > { %p940_p5 = scmp.lt.s32.totalorder %s938_s14, %s931_s13 }
  0x3f   : > { %p934_p12 = pnand %p932_p13, %p864_p3 }
  0x40   : > { %p941_p6 = por %p940_p5, %p939_p2 }
  0x41   : > { %p935_p1 = pneg %p934_p12 }
  0x43   : > { %p942_p7 = pnand %p941_p6, %p935_p1 }
  0x45   : > { %945 = shalt.err (!%p942_p7)
}
  0x46   : > { %791 = dma.hbm_to_vmem [thread:$0]  (!%p1208_p0), %s314_s26, 128, %s317_s22, %s1220_s29  }
  0x47   : > { %325 = sbr.rel (%p1234_p4) target bundleno = 183 (0xb7), region = 32  ;;  %s1269_s15 = sand.u32 (!%p1234_p4), 1, %s1070_s19  }
  0x48   : > { %s753_s28 = sshll.u32 (!%p1234_p4), %s1269_s15, 3  ;;  %s328_s16 = scalar_lea.sflag (!%p1234_p4), [#allocation3], %s1269_s15 }
  0x49   : > { %s331_s27 = scalar_lea.vmem (!%p1234_p4), [#allocation2], %s753_s28 }
  0x4c   : > { %1049 = dma.done.wait (%p1179_p8), %s328_s16, 128  }
  0x4d   : > { %1051 = vsyncadd (%p1179_p8), %s328_s16, 4294967168  ;;  %s336_s26 = sand.u32 1, %s1159_s24   ;;  %s340_s12 = scalar_lea.vmem [#allocation5], %s753_s28 }
  0x4e   : > { %s337_s11 = scalar_lea.sflag [#allocation6], %s336_s26 }
  0x4f   : > { %1053 = dma.done.wait (%p1179_p8), %s337_s11, 256  }
  0x50   : > { %1055 = vsyncadd (%p1179_p8), %s337_s11, 4294967040  ;;  %s756_s29 = sshll.u32 %s1269_s15, 1  ;;  %s1286_s25 = scalar_lea.vmem [#allocation11], %s1269_s15  ;;  %v1091_v0 = vmov 0.0   ;;  %v437_v2 = vld [vmem:[%s331_s27] sm:$0xff]  ;;  %v464_v3 = vld [vmem:[%s340_s12] sm:$0xff] }
  0x51   : > { %418 = vst [vmem:[%s1286_s25] sm:$0x1] %v1091_v0  ;;  %s1289_s9 = scalar_lea.vmem [#allocation9], %s756_s29  ;;  %s1293_s1 = scalar_lea.vmem [#allocation8], %s756_s29  ;;  %856 = vlog2.f32 %v437_v2 }
  0x52   : > { %416 = vst [vmem:[%s1289_s9] sm:$0x1] %v1091_v0  ;;  %417 = vst [vmem:[%s1289_s9 + $0x1] sm:$0x1] %v1091_v0  ;;  %s349_s30 = scalar_lea.vmem [#allocation7], %s753_s28  ;;  %858 = vlog2.f32 %v464_v3  ;;  %s552_s22 = sshll.u32 %s1286_s25, 4  ;;  %s1312_s22 = int_to_ptr.vmem [resolvable:$true] %s552_s22 }
  0x53   : > { %414 = vst [vmem:[%s1293_s1] sm:$0x1] %v1091_v0  ;;  %415 = vst [vmem:[%s1293_s1 + $0x1] sm:$0x1] %v1091_v0  ;;  %v419_v1 = vld [vmem:[%s349_s30] sm:$0xff]  ;;  %s765_s13 = sshll.u32 %s1078_s21, 4  ;;  %s517_s17 = sshll.u32 %s1293_s1, 4  ;;  %s1326_s17 = int_to_ptr.vmem [resolvable:$true] %s517_s17 }
  0x54   : > { %vm420_vm0 = vcmp.gt.f32.partialorder %v419_v1, 0.1  ;;  %vm421_vm1 = vcmp.lt.f32.partialorder %v419_v1, 10.0  ;;  %s534_s23 = sshll.u32 %s1289_s9, 4  ;;  %s1324_s7 = scalar_lea.hbm %s1447_s3, %s765_s13  ;;  %s1335_s23 = int_to_ptr.vmem [resolvable:$true] %s534_s23 }
  0x55   : > { %vm1297_vm2 = vmand %vm420_vm0, %vm421_vm1  ;;  %s1332_s16 = scalar_lea.hbm %s1448_s4, %s765_s13  ;;  %s1340_s12 = scalar_lea.hbm %s1449_s5, %s765_s13 }
  0x56   : > { %v423_v5 = vsel %vm1297_vm2, %v419_v1, 1.0  ;;  %v758_v6 = vsel %vm1297_vm2, 1.0, %v1091_v0  ;;  %s494_s29 = scalar_lea.sflag [#allocation4], %s1269_s15  ;;  %s1092_s30 = smov [#allocation8]  }
  0x57   : > { %860 = vlog2.f32 %v423_v5  ;;  %v429_v7 = vrot.slane %v758_v6, 4  ;;  %s950_s14 = sshll.u32 %s1092_s30, 4  ;;  %s951_s14 = int_to_ptr.vmem [resolvable:$false] %s950_s14 }
  0x58   : > { %v426_v12 = vld [vmem:[%s1286_s25] sm:$0x1]  ;;  %s952_s21 = scalar_lea.vmem %s951_s14, 64  ;;  %p953_p4 = scmp.lt.s32.totalorder %s1326_s17, %s951_s14 }
  0x59   : > { %v430_v8 = vadd.f32 %v758_v6, %v429_v7  ;;  %v454_v51 = vld [vmem:[%s1289_s9] sm:$0x1]  ;;  %v761_v55 = vld [vmem:[%s1289_s9 + $0x1] sm:$0x1] }
  0x5a   : > { %v445_v46 = vld [vmem:[%s1293_s1] sm:$0x1]  ;;  %v759_v50 = vld [vmem:[%s1293_s1 + $0x1] sm:$0x1] }
  0x5b   : > { %v431_v9 = vrot.slane %v430_v8, 2 }
  0x5d   : > { %v432_v10 = vadd.f32 %v431_v9, %v430_v8 }
  0x5e   : > { %v857_v13 = vpop.eup %856 }
  0x5f   : > { %v433_v11 = vrot.slane %v432_v10, 1  ;;  %v859_v15 = vpop.eup %858  ;;  %v439_v16 = vmul.f32 0.6931472, %v857_v13 }
  0x60   : > { %v466_v17 = vmul.f32 0.6931472, %v859_v15 }
  0x61   : > { %v434_v14 = vadd.f32 %v433_v11, %v432_v10 }
  0x63   : > { %v435_v18 = vadd.f32 %v434_v14, %v426_v12 }
  0x64   : > { %v861_v19 = vpop.eup %860 }
  0x65   : > { %v425_v20 = vmul.f32 0.6931472, %v861_v19  ;;  %436 = vst [vmem:[%s1286_s25] sm:$0x1] %v435_v18  ;;  %s946_s25 = scalar_lea.vmem %s1326_s17, 32 }
  0x66   : > { %p947_p8 = scmp.ne.s32.totalorder %s1326_s17, %s946_s25  ;;  %p954_p10 = scmp.lt.s32.totalorder %s952_s21, %s946_s25 }
  0x67   : > { %v440_v21 = vsub.f32 %v439_v16, %v425_v20  ;;  %v467_v22 = vsub.f32 %v466_v17, %v425_v20 }
  0x68   : > { %p948_p0 = pnand %p947_p8, %p1183_p9  ;;  %p955_p13 = por %p954_p10, %p953_p4 }
  0x69   : > { %v441_v23 = vand.u32 2147483647, %v440_v21  ;;  %v468_v24 = vand.u32 2147483647, %v467_v22 }
  0x6a   : > { %p949_p3 = pneg %p948_p0 }
  0x6b   : > { %vm442_vm3 = vcmp.gt.f32.partialorder %v441_v23, 0.001  ;;  %vm469_vm4 = vcmp.gt.f32.partialorder %v468_v24, 0.001 }
  0x6c   : > { %vm443_vm5 = vmand %vm1297_vm2, %vm442_vm3  ;;  %p956_p12 = pnand %p955_p13, %p949_p3 }
  0x6d   : > { %v444_v25 = vsel %vm443_vm5, %v440_v21, 0.0  ;;  %vm470_vm6 = vmand %vm1297_vm2, %vm469_vm4 }
  0x6e   : > { %v455_v26 = vmul.f32 %v444_v25, %v444_v25  ;;  %v471_v27 = vsel %vm470_vm6, %v467_v22, 0.0  ;;  %v446_v28 = vrot.slane %v444_v25, 4 }
  0x6f   : > { %v484_v29 = vmul.f32 %v471_v27, %v471_v27  ;;  %v474_v30 = vrot.slane %v471_v27, 4 }
  0x70   : > { %v456_v31 = vrot.slane %v455_v26, 4  ;;  %v447_v32 = vadd.f32 %v446_v28, %v444_v25 }
  0x71   : > { %v485_v33 = vrot.slane %v484_v29, 4  ;;  %v475_v34 = vadd.f32 %v474_v30, %v471_v27 }
  0x72   : > { %v457_v35 = vadd.f32 %v456_v31, %v455_v26  ;;  %v448_v36 = vrot.slane %v447_v32, 2 }
  0x73   : > { %v486_v37 = vadd.f32 %v485_v33, %v484_v29  ;;  %v476_v38 = vrot.slane %v475_v34, 2 }
  0x74   : > { %v458_v39 = vrot.slane %v457_v35, 2  ;;  %v449_v40 = vadd.f32 %v448_v36, %v447_v32 }
  0x75   : > { %v487_v41 = vrot.slane %v486_v37, 2  ;;  %v477_v42 = vadd.f32 %v476_v38, %v475_v34 }
  0x76   : > { %v459_v43 = vadd.f32 %v458_v39, %v457_v35  ;;  %v450_v44 = vrot.slane %v449_v40, 1 }
  0x77   : > { %v488_v45 = vadd.f32 %v487_v41, %v486_v37  ;;  %v478_v47 = vrot.slane %v477_v42, 1 }
  0x78   : > { %v460_v48 = vrot.slane %v459_v43, 1  ;;  %v451_v49 = vadd.f32 %v450_v44, %v449_v40 }
  0x79   : > { %v489_v52 = vrot.slane %v488_v45, 1  ;;  %v479_v53 = vadd.f32 %v478_v47, %v477_v42 }
  0x7a   : > { %v461_v54 = vadd.f32 %v460_v48, %v459_v43  ;;  %v452_v56 = vadd.f32 %v451_v49, %v445_v46 }
  0x7b   : > { %v490_v57 = vadd.f32 %v489_v52, %v488_v45  ;;  %v480_v58 = vadd.f32 %v759_v50, %v479_v53 }
  0x7c   : > { %v462_v59 = vadd.f32 %v461_v54, %v454_v51  ;;  %453 = vst [vmem:[%s1293_s1] sm:$0x1] %v452_v56 }
  0x7d   : > { %v491_v60 = vadd.f32 %v761_v55, %v490_v57  ;;  %760 = vst [vmem:[%s1293_s1 + $0x1] sm:$0x1] %v480_v58 }
  0x7e   : > { %463 = vst [vmem:[%s1289_s9] sm:$0x1] %v462_v59 }
  0x7f   : > { %959 = shalt.err (!%p956_p12)
}
  0x80   : > { %s960_s1 = scalar_lea.hbm %s1324_s7, 32  ;;  %s964_s28 = scalar_lea.hbm %s1447_s3, 64 }
  0x81   : > { %p961_p1 = scmp.ne.s32.totalorder %s1324_s7, %s960_s1  ;;  %p965_p6 = scmp.lt.s32.totalorder %s1324_s7, %s1447_s3 }
  0x82   : > { %p966_p7 = scmp.lt.s32.totalorder %s964_s28, %s960_s1 }
  0x83   : > { %p962_p2 = pnand %p961_p1, %p1183_p9 }
  0x84   : > { %p967_p8 = por %p966_p7, %p965_p6 }
  0x85   : > { %p963_p5 = pneg %p962_p2 }
  0x87   : > { %p968_p0 = pnand %p967_p8, %p963_p5 }
  0x89   : > { %971 = shalt.err (!%p968_p0)
}
  0x8a   : > { %s1093_s25 = smov 16   ;;  %s1094_s30 = smov 32   ;;  %762 = vst [vmem:[%s1289_s9 + $0x1] sm:$0x1] %v491_v60 }
  0x8b   : > { %s1095_s14 = smov 1   ;;  %s1372_s21 = scalar_lea.sflag [#allocation10], %s336_s26 }
  0x8c   : > { %776 = dma.vmem_to_hbm [thread:$0]  (%p1183_p9), %s1326_s17, 32, %s1324_s7, %s494_s29, %s1093_s25, %s1094_s30, %s1095_s14  }
  0x8d   : > { %s972_s1 = scalar_lea.vmem %s1335_s23, 32  ;;  %s1096_s13 = smov [#allocation9]  }
  0x8e   : > { %p973_p3 = scmp.ne.s32.totalorder %s1335_s23, %s972_s1  ;;  %s976_s10 = sshll.u32 %s1096_s13, 4  ;;  %s977_s10 = int_to_ptr.vmem [resolvable:$false] %s976_s10 }
  0x8f   : > { %s978_s28 = scalar_lea.vmem %s977_s10, 64  ;;  %p979_p13 = scmp.lt.s32.totalorder %s1335_s23, %s977_s10 }
  0x90   : > { %p974_p4 = pnand %p973_p3, %p1183_p9  ;;  %p980_p12 = scmp.lt.s32.totalorder %s978_s28, %s972_s1 }
  0x92   : > { %p975_p10 = pneg %p974_p4  ;;  %p981_p1 = por %p980_p12, %p979_p13 }
  0x94   : > { %p982_p2 = pnand %p981_p1, %p975_p10 }
  0x96   : > { %985 = shalt.err (!%p982_p2)
}
  0x97   : > { %s986_s24 = scalar_lea.hbm %s1332_s16, 32  ;;  %s990_s9 = scalar_lea.hbm %s1448_s4, 64 }
  0x98   : > { %p987_p5 = scmp.ne.s32.totalorder %s1332_s16, %s986_s24  ;;  %p991_p8 = scmp.lt.s32.totalorder %s1332_s16, %s1448_s4 }
  0x99   : > { %p992_p0 = scmp.lt.s32.totalorder %s990_s9, %s986_s24 }
  0x9a   : > { %p988_p6 = pnand %p987_p5, %p1183_p9 }
  0x9b   : > { %p993_p3 = por %p992_p0, %p991_p8 }
  0x9c   : > { %p989_p7 = pneg %p988_p6 }
  0x9e   : > { %p994_p4 = pnand %p993_p3, %p989_p7 }
  0xa0   : > { %997 = shalt.err (!%p994_p4)
}
  0xa1   : > { %777 = dma.vmem_to_hbm [thread:$0]  (%p1183_p9), %s1335_s23, 32, %s1332_s16, %s1372_s21, %s1093_s25, %s1094_s30, %s1095_s14  }
  0xa2   : > { %s998_s29 = scalar_lea.vmem %s1312_s22, 16  ;;  %s1097_s27 = smov [#allocation11]  }
  0xa3   : > { %p999_p10 = scmp.ne.s32.totalorder %s1312_s22, %s998_s29  ;;  %s1002_s11 = sshll.u32 %s1097_s27, 4  ;;  %s1003_s11 = int_to_ptr.vmem [resolvable:$false] %s1002_s11 }
  0xa4   : > { %s1004_s1 = scalar_lea.vmem %s1003_s11, 32  ;;  %p1005_p1 = scmp.lt.s32.totalorder %s1312_s22, %s1003_s11 }
  0xa5   : > { %p1000_p13 = pnand %p999_p10, %p1183_p9  ;;  %p1006_p2 = scmp.lt.s32.totalorder %s1004_s1, %s998_s29 }
  0xa7   : > { %p1001_p12 = pneg %p1000_p13  ;;  %p1007_p5 = por %p1006_p2, %p1005_p1 }
  0xa9   : > { %p1008_p6 = pnand %p1007_p5, %p1001_p12 }
  0xab   : > { %1011 = shalt.err (!%p1008_p6)
}
  0xac   : > { %s1012_s13 = scalar_lea.hbm %s1340_s12, 16  ;;  %s1016_s25 = scalar_lea.hbm %s1449_s5, 32 }
  0xad   : > { %p1013_p7 = scmp.ne.s32.totalorder %s1340_s12, %s1012_s13  ;;  %p1017_p3 = scmp.lt.s32.totalorder %s1340_s12, %s1449_s5 }
  0xae   : > { %p1018_p4 = scmp.lt.s32.totalorder %s1016_s25, %s1012_s13 }
  0xaf   : > { %p1014_p8 = pnand %p1013_p7, %p1183_p9 }
  0xb0   : > { %p1019_p10 = por %p1018_p4, %p1017_p3 }
  0xb1   : > { %p1015_p0 = pneg %p1014_p8 }
  0xb3   : > { %p1020_p13 = pnand %p1019_p10, %p1015_p0 }
  0xb5   : > { %1023 = shalt.err (!%p1020_p13)
}
  0xb6   : > { %778 = dma.vmem_to_hbm [thread:$0]  (%p1183_p9), %s1312_s22, 16, %s1340_s12, %s1372_s21  }
  0xb7 PF: > { %s1471_s10 = sld [smem:[#allocation17_spill]]  ;;  %s564_s28 = sand.u32 1, %s1066_s18  }
  0xb8   : > { %s565_s24 = scalar_lea.sflag [#allocation4], %s564_s28 }
  0xbd   : > { %p1472_p12 = scmp.ge.s32.totalorder %s1471_s10, 2 }
  0xbf   : > { %p793_p1 = pnand %p1472_p12, %p1192_p11 }
  0xc1   : > { %p794_p2 = pneg %p793_p1 }
  0xc3   : > { %1057 = dma.done.wait (%p794_p2), %s565_s24, 32  }
  0xc4   : > { %1059 = vsyncadd (%p794_p2), %s565_s24, 4294967264  ;;  %s1473_s15 = sadd.s32 4294967294, %s1471_s10  }
  0xc5   : > { %s573_s26 = sand.u32 1, %s1473_s15  }
  0xc6   : > { %s574_s6 = scalar_lea.sflag [#allocation10], %s573_s26 }
  0xc7   : > { %1061 = dma.done.wait (%p794_p2), %s574_s6, 48  }
  0xc8   : > { %1063 = vsyncadd (%p794_p2), %s574_s6, 4294967248  ;;  %s28_s23 = sadd.s32 1, %s1471_s10   ;;  %s1474_s22 = sld [smem:[#allocation19_spill]] }
  0xc9   : > { %p25_p9 = scmp.ge.s32.totalorder %s28_s23, 4   ;;  %s1475_s21 = sld [smem:[#allocation16_spill]] }
  0xca   : > { %s1476_s8 = sld [smem:[#allocation18_spill]]  ;;  %s1477_s18 = smov %s1070_s19 }
  0xcb   : > { %s1478_s19 = smov %s1074_s20 }
  0xcc   :  { %27 = sbr.rel (!%p25_p9) target bundleno = 12 (0xc), region = 139 }
  0xce   : > { %s1479_s20 = smov %s1474_s22 }
  0xd0   : > { %s1480_s22 = smov %s1476_s8 }
  0xd1   :  { %587 = vsyncpa [#allocation3], 1 }
  0xd2   :  { %589 = vsyncpa [#allocation3 + $0x1], 1 }
  0xd3   :  { %590 = vsyncpa [#allocation6], 1 }
  0xd4   :  { %592 = vsyncpa [#allocation6 + $0x1], 1 }
  0xd5   :  { %593 = vsyncpa [#allocation4], 1 }
  0xd6   :  { %595 = vsyncpa [#allocation4 + $0x1], 1 }
  0xd7   :  { %596 = vsyncpa [#allocation10], 1 }
  0xd8   :  { %598 = vsyncpa [#allocation10 + $0x1], 1 }

</bundles_post_ra>
